<compile_context>
chip_gen: v6e
topology: v6e:2x2x1
jax: 0.10.0
libtpu: 0.0.40
codegen_flags: <defaults>
</compile_context>

<pallas_src>
import functools
import math

import jax
import jax.numpy as jnp
from jax.experimental import pallas as pl
from jax.experimental.pallas import tpu as pltpu


def _pick_tile(n, candidates):
    """Largest candidate tile that divides n, else n itself."""
    for c in candidates:
        if n % c == 0:
            return c
    return n


def _attn_tiles(S, num_heads, head_dim, H, budget_bytes=20 * 1024 * 1024):
    """Pick (tq, tk) so the Stage-2 per-step working set stays under budget."""
    tq = _pick_tile(S, (256, 128, 64, 32, 16, 8))
    tk = _pick_tile(S, (512, 256, 128, 64, 32, 16, 8))

    def est(tq_, tk_):
        scores = 2 * num_heads * tq_ * tk_ * 4              # s + p (f32)
        kv = 2 * 2 * num_heads * tk_ * head_dim * 2         # K,V double-buffered bf16
        qb = 2 * num_heads * tq_ * head_dim * 2             # Q double-buffered bf16
        out = 2 * tq_ * H * 4                               # output block
        scr = num_heads * tq_ * (head_dim + 2) * 4          # m, l, acc scratch
        return scores + kv + qb + out + scr

    while est(tq, tk) > budget_bytes and tk > 128 and S % (tk // 2) == 0:
        tk //= 2
    while est(tq, tk) > budget_bytes and tq > 128 and S % (tq // 2) == 0:
        tq //= 2
    return tq, tk


# ----------------------------------------------------------------------------
# Kernel 1: fused QKV projection, head-major outputs.
# ----------------------------------------------------------------------------
def _qkv_proj_kernel(x_ref, w_ref, b_ref, q_ref, k_ref, v_ref, *,
                     num_heads, head_dim):
    """x_ref: (1, tr, H) bf16; w_ref: (H, 3H) bf16; b_ref: (1, 3H) f32.

    Outputs q/k/v head-major: (1, nh, tr, d) bf16.  Q is already pre-scaled by
    1/sqrt(d) (folded into the weights in the wrapper).
    """
    tr = x_ref.shape[1]
    hidden = num_heads * head_dim
    # One wide MXU pass (N = 3H) with f32 accumulation, a single bias add, and
    # a single bf16 cast before the (half-width) head-major relayout.
    qkv = (jnp.dot(x_ref[0], w_ref[...], preferred_element_type=jnp.float32)
           + b_ref[0]).astype(jnp.bfloat16)                     # (tr, 3H)

    def head_major(block):                                      # (tr, H) -> (nh, tr, d)
        return block.reshape(tr, num_heads, head_dim).transpose(1, 0, 2)

    q_ref[0] = head_major(qkv[:, :hidden])
    k_ref[0] = head_major(qkv[:, hidden:2 * hidden])
    v_ref[0] = head_major(qkv[:, 2 * hidden:])


# ----------------------------------------------------------------------------
# Kernel 2: flash-style multi-head attention for one (batch, q-tile, kv-tile).
# ----------------------------------------------------------------------------
def _flash_attn_kernel(q_ref, k_ref, v_ref, mask_ref, o_ref,
                       m_sc, l_sc, acc_sc, *, num_heads, head_dim):
    """q_ref: (1, nh, tq, d) bf16 (pre-scaled); k_ref/v_ref: (1, nh, tk, d) bf16;
    mask_ref: (1, 1, 1, tk) f32 additive; o_ref: (1, tq, H).

    Scratch m/l: (nh, tq, 1) f32, acc: (nh, tq, d) f32 -- resident across the
    innermost ("arbitrary") KV-tile grid axis.
    """
    ki = pl.program_id(2)

    @pl.when(ki == 0)
    def _():
        m_sc[...] = jnp.full(m_sc.shape, -jnp.inf, dtype=m_sc.dtype)
        l_sc[...] = jnp.zeros(l_sc.shape, dtype=l_sc.dtype)
        acc_sc[...] = jnp.zeros(acc_sc.shape, dtype=acc_sc.dtype)

    q = q_ref[0]                                                # (nh, tq, d)
    k = k_ref[0]                                                # (nh, tk, d)
    v = v_ref[0]                                                # (nh, tk, d)

    # Scores for this KV tile: heads batched on the MXU, f32 accumulation,
    # no explicit k.T, no scale (folded into the Q projection).
    s = jax.lax.dot_general(
        q, k, (((2,), (2,)), ((0,), (0,))),
        preferred_element_type=jnp.float32)                     # (nh, tq, tk)
    s = s + mask_ref[0, 0][None, :, :]                          # additive mask

    # Online softmax, f32.
    m_prev = m_sc[...]
    m_new = jnp.maximum(m_prev, s.max(axis=-1, keepdims=True))
    alpha = jnp.exp(m_prev - m_new)
    p = jnp.exp(s - m_new)
    l_sc[...] = alpha * l_sc[...] + p.sum(axis=-1, keepdims=True)
    acc_sc[...] = alpha * acc_sc[...] + jax.lax.dot_general(
        p.astype(v.dtype), v, (((2,), (1,)), ((0,), (0,))),
        preferred_element_type=jnp.float32)                     # (nh, tq, d)
    m_sc[...] = m_new

    @pl.when(ki == pl.num_programs(2) - 1)
    def _():
        # Normalize (EUP reciprocal) and merge heads with per-head lane-slice
        # stores into the lane-dense (tq, H) output block.
        ctx = acc_sc[...] * pl.reciprocal(l_sc[...], approx=True)
        for h in range(num_heads):
            o_ref[0, :, h * head_dim:(h + 1) * head_dim] = (
                ctx[h].astype(o_ref.dtype))


# ----------------------------------------------------------------------------
# Wrapper
# ----------------------------------------------------------------------------
def gpt2_self_attention(hidden_states, attention_mask,
                        wq, bq, wk, bk, wv, bv, num_heads):
    """hidden_states: (B, S, H) f32, attention_mask: (B, 1, 1, S) f32 additive.

    wq/wk/wv are PyTorch-style Linear weights of shape (out, in) = (H, H);
    biases are (H,).  Returns (B, S, H) in hidden_states.dtype.
    """
    B, S, H = hidden_states.shape
    assert H % num_heads == 0
    head_dim = H // num_heads
    scale = 1.0 / math.sqrt(head_dim)

    # Fold 1/sqrt(d) into the Q projection; fuse QKV weights into one (H, 3H)
    # bf16 block (x @ W layout) and one (1, 3H) f32 bias (added to f32 acc).
    w_qkv = jnp.concatenate([(wq * scale).T, wk.T, wv.T], axis=1
                            ).astype(jnp.bfloat16)
    b_qkv = jnp.concatenate([bq * scale, bk, bv], axis=0
                            ).reshape(1, 3 * H).astype(jnp.float32)

    # bf16 activations into Stage 1 (the kernel multiplies in bf16 anyway) --
    # halves the activation HBM->VMEM DMA bytes.
    x_bf16 = hidden_states.astype(jnp.bfloat16)
    mask = attention_mask.astype(jnp.float32)

    # --- Stage 1: fused QKV projection, gridded over (batch, row tiles). ----
    tr = _pick_tile(S, (512, 256, 128, 64, 32, 16, 8))
    hm_spec = pl.BlockSpec((1, num_heads, tr, head_dim),
                           lambda b, r: (b, 0, r, 0))
    proj = pl.pallas_call(
        functools.partial(_qkv_proj_kernel, num_heads=num_heads,
                          head_dim=head_dim),
        out_shape=tuple(jax.ShapeDtypeStruct((B, num_heads, S, head_dim),
                                             jnp.bfloat16) for _ in range(3)),
        grid_spec=pltpu.PrefetchScalarGridSpec(
            num_scalar_prefetch=0,
            grid=(B, S // tr),
            in_specs=[
                pl.BlockSpec((1, tr, H), lambda b, r: (b, r, 0)),     # x
                pl.BlockSpec((H, 3 * H), lambda b, r: (0, 0)),        # fused W
                pl.BlockSpec((1, 3 * H), lambda b, r: (0, 0)),        # fused b
            ],
            out_specs=(hm_spec, hm_spec, hm_spec),
        ),
        compiler_params=pltpu.CompilerParams(
            dimension_semantics=("parallel", "parallel"),
            vmem_limit_bytes=64 * 1024 * 1024),
    )
    q, k, v = proj(x_bf16, w_qkv, b_qkv)

    # --- Stage 2: flash-style attention over (batch, q-tiles, kv-tiles). ----
    tq, tk = _attn_tiles(S, num_heads, head_dim, H)
    # With B >= 2, keep the q-tile axis "arbitrary" so the two TensorCores
    # split on batch and never re-DMA the same K/V stream.
    qi_sem = "parallel" if B == 1 else "arbitrary"
    attn = pl.pallas_call(
        functools.partial(_flash_attn_kernel, num_heads=num_heads,
                          head_dim=head_dim),
        out_shape=jax.ShapeDtypeStruct((B, S, H), hidden_states.dtype),
        grid_spec=pltpu.PrefetchScalarGridSpec(
            num_scalar_prefetch=0,
            grid=(B, S // tq, S // tk),
            in_specs=[
                pl.BlockSpec((1, num_heads, tq, head_dim),
                             lambda b, qi, ki: (b, 0, qi, 0)),          # Q tile
                pl.BlockSpec((1, num_heads, tk, head_dim),
                             lambda b, qi, ki: (b, 0, ki, 0)),          # K tile
                pl.BlockSpec((1, num_heads, tk, head_dim),
                             lambda b, qi, ki: (b, 0, ki, 0)),          # V tile
                pl.BlockSpec((1, 1, 1, tk),
                             lambda b, qi, ki: (b, 0, 0, ki)),          # mask tile
            ],
            out_specs=pl.BlockSpec((1, tq, H), lambda b, qi, ki: (b, qi, 0)),
            scratch_shapes=[
                pltpu.VMEM((num_heads, tq, 1), jnp.float32),            # running max
                pltpu.VMEM((num_heads, tq, 1), jnp.float32),            # running denom
                pltpu.VMEM((num_heads, tq, head_dim), jnp.float32),     # acc
            ],
        ),
        compiler_params=pltpu.CompilerParams(
            dimension_semantics=("parallel", qi_sem, "arbitrary"),
            vmem_limit_bytes=64 * 1024 * 1024),
    )
    return attn(q, k, v, mask)


# ----------------------------------------------------------------------------
# Pure-JAX reference (exactly the PyTorch forward), for verification.
# ----------------------------------------------------------------------------
def _reference(hidden_states, attention_mask, wq, bq, wk, bk, wv, bv, num_heads):
    B, S, H = hidden_states.shape
    d = H // num_heads

    def proj(w, b):
        y = jnp.einsum('bsh,oh->bso', hidden_states, w) + b
        return y.reshape(B, S, num_heads, d).transpose(0, 2, 1, 3)   # (B, nh, S, d)

    q, k, v = proj(wq, bq), proj(wk, bk), proj(wv, bv)
    scores = jnp.einsum('bhqd,bhkd->bhqk', q, k) / math.sqrt(d)
    scores = scores + attention_mask                                  # (B,1,1,S)
    probs = jax.nn.softmax(scores, axis=-1)
    ctx = jnp.einsum('bhqk,bhkd->bhqd', probs, v)
    return ctx.transpose(0, 2, 1, 3).reshape(B, S, H)


if __name__ == "__main__":
    B, S, H, NUM_HEADS = 2, 8, 32, 4

    key = jax.random.PRNGKey(0)
    k_x, k_wq, k_wk, k_wv, k_bq, k_bk, k_bv = jax.random.split(key, 7)

    hidden_states = jax.random.normal(k_x, (B, S, H), dtype=jnp.float32)

    # PyTorch-style Linear params: weights (out, in) = (H, H), biases (H,).
    wq = 0.02 * jax.random.normal(k_wq, (H, H), dtype=jnp.float32)
    wk = 0.02 * jax.random.normal(k_wk, (H, H), dtype=jnp.float32)
    wv = 0.02 * jax.random.normal(k_wv, (H, H), dtype=jnp.float32)
    bq = 0.01 * jax.random.normal(k_bq, (H,), dtype=jnp.float32)
    bk = 0.01 * jax.random.normal(k_bk, (H,), dtype=jnp.float32)
    bv = 0.01 * jax.random.normal(k_bv, (H,), dtype=jnp.float32)

    # Additive attention mask: mask out the last 2 key positions of batch 1.
    mask = jnp.zeros((B, 1, 1, S), dtype=jnp.float32)
    mask = mask.at[1, 0, 0, -2:].set(-1e9)

    out = gpt2_self_attention(hidden_states, mask, wq, bq, wk, bk, wv, bv,
                              NUM_HEADS)
    out = jax.block_until_ready(out)

    ref = _reference(hidden_states, mask, wq, bq, wk, bk, wv, bv, NUM_HEADS)
    assert out.shape == (B, S, H)
    # bf16 matmul operands + approx reciprocal vs f32 reference.
    assert jnp.allclose(out, ref, atol=2e-2, rtol=2e-2), "mismatch vs reference"

    print("KERNEL_OK")
</pallas_src>

<mosaic_0001>
module attributes {stable_mosaic.version = 11 : i64} {
  func.func @_qkv_proj_kernel(%arg0: i32, %arg1: i32, %arg2: memref<1x8x32xbf16, #tpu.memory_space<vmem>>, %arg3: memref<32x96xbf16, #tpu.memory_space<vmem>>, %arg4: memref<1x96xf32, #tpu.memory_space<vmem>>, %arg5: memref<1x4x8x8xbf16, #tpu.memory_space<vmem>>, %arg6: memref<1x4x8x8xbf16, #tpu.memory_space<vmem>>, %arg7: memref<1x4x8x8xbf16, #tpu.memory_space<vmem>>) attributes {dimension_semantics = [#tpu.dimension_semantics<parallel>, #tpu.dimension_semantics<parallel>], iteration_bounds = array<i64: 2, 1>, scalar_prefetch = 0 : i64, scratch_operands = 0 : i64, tpu.core_type = #tpu.core_type<tc>, window_params = [{transform_indices = @transform_0, window_bounds = array<i64: 1, 8, 32>}, {pipeline_mode = #tpu.pipeline_mode<synchronous>, transform_indices = @transform_1, window_bounds = array<i64: 32, 96>}, {pipeline_mode = #tpu.pipeline_mode<synchronous>, transform_indices = @transform_2, window_bounds = array<i64: 1, 96>}, {transform_indices = @transform_3, window_bounds = array<i64: 1, 4, 8, 8>}, {transform_indices = @transform_4, window_bounds = array<i64: 1, 4, 8, 8>}, {transform_indices = @transform_5, window_bounds = array<i64: 1, 4, 8, 8>}]} {
    %c0 = arith.constant 0 : index
    %c0_0 = arith.constant 0 : index
    %c0_1 = arith.constant 0 : index
    %0 = vector.load %arg2[%c0, %c0_0, %c0_1] : memref<1x8x32xbf16, #tpu.memory_space<vmem>>, vector<1x8x32xbf16>
    %1 = vector.shape_cast %0 : vector<1x8x32xbf16> to vector<8x32xbf16>
    %c0_2 = arith.constant 0 : index
    %c0_3 = arith.constant 0 : index
    %2 = vector.load %arg3[%c0_2, %c0_3] : memref<32x96xbf16, #tpu.memory_space<vmem>>, vector<32x96xbf16>
    %cst = arith.constant dense<0.000000e+00> : vector<8x96xf32>
    %3 = tpu.matmul %1, %2, %cst {dimension_numbers = #tpu.dot_dimension_numbers<[1], [0], [0], [1], [0, 0, 1, 1], [], []>} : vector<8x32xbf16>, vector<32x96xbf16>, vector<8x96xf32> -> vector<8x96xf32>
    %c0_4 = arith.constant 0 : index
    %c0_5 = arith.constant 0 : index
    %4 = vector.load %arg4[%c0_4, %c0_5] : memref<1x96xf32, #tpu.memory_space<vmem>>, vector<1x96xf32>
    %5 = vector.shape_cast %4 : vector<1x96xf32> to vector<96xf32>
    %6 = vector.shape_cast %5 : vector<96xf32> to vector<1x96xf32>
    %7 = vector.broadcast %6 : vector<1x96xf32> to vector<8x96xf32>
    %8 = arith.addf %3, %7 : vector<8x96xf32>
    %9 = arith.truncf %8 : vector<8x96xf32> to vector<8x96xbf16>
    %10 = vector.extract_strided_slice %9 {offsets = [0, 0], sizes = [8, 32], strides = [1, 1]} : vector<8x96xbf16> to vector<8x32xbf16>
    %11 = vector.shape_cast %10 : vector<8x32xbf16> to vector<8x4x8xbf16>
    %12 = tpu.transpose %11, [1, 0, 2] : vector<8x4x8xbf16> -> vector<4x8x8xbf16>
    %c0_6 = arith.constant 0 : index
    %c0_7 = arith.constant 0 : index
    %c0_8 = arith.constant 0 : index
    %c0_9 = arith.constant 0 : index
    %13 = vector.load %arg5[%c0_6, %c0_7, %c0_8, %c0_9] : memref<1x4x8x8xbf16, #tpu.memory_space<vmem>>, vector<1x4x8x8xbf16>
    %14 = vector.shape_cast %13 : vector<1x4x8x8xbf16> to vector<4x8x8xbf16>
    %15 = vector.shape_cast %12 : vector<4x8x8xbf16> to vector<1x4x8x8xbf16>
    tpu.vector_store %arg5[%c0_6, %c0_7, %c0_8, %c0_9], %15 {strides = array<i32>} : memref<1x4x8x8xbf16, #tpu.memory_space<vmem>>, vector<1x4x8x8xbf16>,
    %16 = vector.extract_strided_slice %9 {offsets = [0, 32], sizes = [8, 32], strides = [1, 1]} : vector<8x96xbf16> to vector<8x32xbf16>
    %17 = vector.shape_cast %16 : vector<8x32xbf16> to vector<8x4x8xbf16>
    %18 = tpu.transpose %17, [1, 0, 2] : vector<8x4x8xbf16> -> vector<4x8x8xbf16>
    %c0_10 = arith.constant 0 : index
    %c0_11 = arith.constant 0 : index
    %c0_12 = arith.constant 0 : index
    %c0_13 = arith.constant 0 : index
    %19 = vector.load %arg6[%c0_10, %c0_11, %c0_12, %c0_13] : memref<1x4x8x8xbf16, #tpu.memory_space<vmem>>, vector<1x4x8x8xbf16>
    %20 = vector.shape_cast %19 : vector<1x4x8x8xbf16> to vector<4x8x8xbf16>
    %21 = vector.shape_cast %18 : vector<4x8x8xbf16> to vector<1x4x8x8xbf16>
    tpu.vector_store %arg6[%c0_10, %c0_11, %c0_12, %c0_13], %21 {strides = array<i32>} : memref<1x4x8x8xbf16, #tpu.memory_space<vmem>>, vector<1x4x8x8xbf16>,
    %22 = vector.extract_strided_slice %9 {offsets = [0, 64], sizes = [8, 32], strides = [1, 1]} : vector<8x96xbf16> to vector<8x32xbf16>
    %23 = vector.shape_cast %22 : vector<8x32xbf16> to vector<8x4x8xbf16>
    %24 = tpu.transpose %23, [1, 0, 2] : vector<8x4x8xbf16> -> vector<4x8x8xbf16>
    %c0_14 = arith.constant 0 : index
    %c0_15 = arith.constant 0 : index
    %c0_16 = arith.constant 0 : index
    %c0_17 = arith.constant 0 : index
    %25 = vector.load %arg7[%c0_14, %c0_15, %c0_16, %c0_17] : memref<1x4x8x8xbf16, #tpu.memory_space<vmem>>, vector<1x4x8x8xbf16>
    %26 = vector.shape_cast %25 : vector<1x4x8x8xbf16> to vector<4x8x8xbf16>
    %27 = vector.shape_cast %24 : vector<4x8x8xbf16> to vector<1x4x8x8xbf16>
    tpu.vector_store %arg7[%c0_14, %c0_15, %c0_16, %c0_17], %27 {strides = array<i32>} : memref<1x4x8x8xbf16, #tpu.memory_space<vmem>>, vector<1x4x8x8xbf16>,
    return
  }
  func.func @transform_0(%arg0: i32, %arg1: i32) -> (i32, i32, i32) {
    %c0_i32 = arith.constant 0 : i32
    %c0_i32_0 = arith.constant 0 : i32
    return %arg0, %arg1, %c0_i32 : i32, i32, i32
  }
  func.func @transform_1(%arg0: i32, %arg1: i32) -> (i32, i32) {
    %c0_i32 = arith.constant 0 : i32
    %c0_i32_0 = arith.constant 0 : i32
    %c0_i32_1 = arith.constant 0 : i32
    return %c0_i32, %c0_i32_0 : i32, i32
  }
  func.func @transform_2(%arg0: i32, %arg1: i32) -> (i32, i32) {
    %c0_i32 = arith.constant 0 : i32
    %c0_i32_0 = arith.constant 0 : i32
    %c0_i32_1 = arith.constant 0 : i32
    return %c0_i32, %c0_i32_0 : i32, i32
  }
  func.func @transform_3(%arg0: i32, %arg1: i32) -> (i32, i32, i32, i32) {
    %c0_i32 = arith.constant 0 : i32
    %c0_i32_0 = arith.constant 0 : i32
    %c0_i32_1 = arith.constant 0 : i32
    return %arg0, %c0_i32, %arg1, %c0_i32_0 : i32, i32, i32, i32
  }
  func.func @transform_4(%arg0: i32, %arg1: i32) -> (i32, i32, i32, i32) {
    %c0_i32 = arith.constant 0 : i32
    %c0_i32_0 = arith.constant 0 : i32
    %c0_i32_1 = arith.constant 0 : i32
    return %arg0, %c0_i32, %arg1, %c0_i32_0 : i32, i32, i32, i32
  }
  func.func @transform_5(%arg0: i32, %arg1: i32) -> (i32, i32, i32, i32) {
    %c0_i32 = arith.constant 0 : i32
    %c0_i32_0 = arith.constant 0 : i32
    %c0_i32_1 = arith.constant 0 : i32
    return %arg0, %c0_i32, %arg1, %c0_i32_0 : i32, i32, i32, i32
  }
}

</mosaic_0001>

<bundles_post_ra>
// kernel: tpu_custom_call.1
= control target key start
LH: loop header
LB: loop body
LE: loop exit
PB: predicated region body
PF: predicated region fallthrough
CT: control target
= control target key end

     0   :  { %s1842_s0 = inlined_call_operand.hbm [shape: bf16[2,8,32], index: 0, kind: input, shape index: {}]   ;;  %s1843_s1 = inlined_call_operand.hbm [shape: bf16[32,96], index: 1, kind: input, shape index: {}]   ;;  %s1844_s2 = inlined_call_operand.vmem [shape: f32[1,96], index: 2, kind: input, shape index: {}]   ;;  %s1845_s3 = inlined_call_operand.hbm [shape: bf16[2,4,8,8], index: 3, kind: output, shape index: {0}]   ;;  %s1846_s4 = inlined_call_operand.hbm [shape: bf16[2,4,8,8], index: 4, kind: output, shape index: {1}]   ;;  %s1847_s5 = inlined_call_operand.hbm [shape: bf16[2,4,8,8], index: 5, kind: output, shape index: {2}]  }
   0x1   :  { %1851 = sst [smem:[#allocation16_spill]] %s1843_s1 }
   0x2   :  { %11 = vsyncpa [#allocation3], 0 }
   0x3   :  { %13 = vsyncpa [#allocation3 + $0x1], 0 }
   0x4   :  { %14 = vsyncpa [#allocation6], 0 }
   0x5   :  { %15 = vsyncpa [#allocation4], 0 }
   0x6   :  { %17 = vsyncpa [#allocation4 + $0x1], 0 }
   0x7   :  { %18 = vsyncpa [#allocation9], 0 }
   0x8   :  { %20 = vsyncpa [#allocation9 + $0x1], 0  ;;  %s1499_s18 = smov 0   ;;  %s1501_s19 = smov 0  }
   0x9   :  { %s1503_s20 = smov 0   ;;  %s1505_s21 = smov 0  }
   0xa   :  { %s1507_s22 = smov 0   ;;  %s1509_s23 = smov 0  }
   0xb LB: > { %s1530_s24 = sadd.s32 4294967295, %s1449_s23   ;;  %s1848_s25 = sadd.s32 4294967294, %s1449_s23   ;;  %s1449_s23 = sphi %s1509_s23, %s26_s23   ;;  %s1445_s22 = sphi %s1507_s22, %s1872_s22   ;;  %s1441_s21 = sphi %s1505_s21, %s1871_s21   ;;  %s1437_s20 = sphi %s1503_s20, %s1870_s20   ;;  %s1433_s19 = sphi %s1501_s19, %s1869_s19   ;;  %s1429_s18 = sphi %s1499_s18, %s1868_s18  }
   0xc   : > { %p60_p0 = scmp.ne.s32.totalorder %s1433_s19, %s1429_s18  ;;  %p1850_p1 = scmp.eq.s32.totalorder %s1530_s24, 0 }
   0xd   : > { %p134_p3 = scmp.eq.s32.totalorder %s1848_s25, 1  ;;  %p1117_p5 = scmp.ge.s32.totalorder %s1449_s23, 1 }
   0xe   : > { %p1541_p4 = por %p1850_p1, %p60_p0  ;;  %p197_p7 = scmp.lt.s32.totalorder %s1449_s23, 3 }
   0xf   : > { %p1546_p6 = por %p134_p3, %p60_p0  ;;  %s1451_s29 = smov [#allocation5]  }
  0x10   : > { %p1551_p8 = pnand %p1117_p5, %p197_p7  ;;  %s209_s30 = sshll.u32 %s1451_s29, 4  ;;  %s210_s30 = int_to_ptr.vmem [resolvable:$true] %s209_s30 }
  0x11   : > { %s1853_s27 = scalar_select %p1546_p6, 1, 0 }
  0x12   : > { %p1169_p9 = pneg %p1551_p8  ;;  %s38_s7 = sadd.s32 1, %s1445_s22 }
  0x13   : > { %s1266_s8 = scalar_lea.vmem %s210_s30, 256  ;;  %p1274_p5 = scmp.lt.s32.totalorder %s210_s30, %s210_s30 }
  0x14   : > { %p1560_p11 = pnand %p1169_p9, %p1850_p1  ;;  %p1267_p13 = scmp.ne.s32.totalorder %s210_s30, %s1266_s8 }
  0x15   : > { %p1275_p7 = scmp.lt.s32.totalorder %s1266_s8, %s1266_s8 }
  0x16   : > { %p1257_p12 = pneg %p1560_p11 }
  0x17   : > { %p1276_p2 = por %p1275_p7, %p1274_p5 }
  0x18   : > { %p1269_p0 = pnand %p1267_p13, %p1257_p12 }
  0x1a   : > { %p1270_p3 = pneg %p1269_p0 }
  0x1c   : > { %p1277_p6 = pnand %p1276_p2, %p1270_p3 }
  0x1e   : > { %1280 = shalt.err (!%p1277_p6)
}
  0x1f   : > { %s1452_s9 = smov 64   ;;  %s1453_s10 = smov 4  }
  0x20   : > { %s1856_s1 = sld [smem:[#allocation16_spill]]  ;;  %p40_p2 = scmp.ge.s32.totalorder %s38_s7, 2 }
  0x21   : > { %s47_s13 = sadd.s32 1, %s1437_s20  ;;  %p54_p6 = scmp.ne.s32.totalorder %s1437_s20, %s1433_s19 }
  0x22   : > { %p55_p9 = scmp.eq.s32.totalorder %s1449_s23, 0  ;;  %s1874_s7 = smov (%p40_p2, %s38_s7), 0 }
  0x23   : > { %1857 = sst [smem:[#allocation15_spill]] %s1874_s7  ;;  %p1859_p13 = scmp.eq.s32.totalorder %s1530_s24, 1 }
  0x24   : > { %p1578_p12 = por %p55_p9, %p54_p6  ;;  %s42_s16 = ssub.s32 %s1445_s22, %s1874_s7 }
  0x25   : > { %p1584_p0 = por %p1859_p13, %p54_p6  ;;  %p1188_p3 = scmp.lt.s32.totalorder %s1449_s23, 2 }
  0x26   : > { %1172 = dma.hbm_to_vmem [thread:$0]  (!%p1560_p11), %s1856_s1, 256, %s210_s30, [#allocation6], %s1452_s9, %s1452_s9, %s1453_s10  }
  0x27   : > { %p45_p11 = scmp.eq.s32.totalorder %s42_s16, 0  ;;  %s226_s17 = sand.u32 1, %s1437_s20  }
  0x28   : > { %s1120_s29 = sshll.u32 %s226_s17, 2  ;;  %s1121_s6 = sshll.u32 %s1445_s22, 6 }
  0x29   : > { %s1593_s30 = scalar_select %p45_p11, %s1437_s20, %s47_s13  }
  0x2a   : > { %s236_s10 = scalar_lea.hbm %s1842_s0, %s1121_s6  ;;  %s230_s11 = scalar_lea.vmem [#allocation2], %s1120_s29 }
  0x2b   : > { %s238_s12 = sshll.u32 %s230_s11, 4  ;;  %p1601_p5 = pnand %p1188_p3, %p1578_p12  ;;  %s239_s12 = int_to_ptr.vmem [resolvable:$true] %s238_s12 }
  0x2c   : > { %s227_s1 = scalar_lea.sflag [#allocation3], %s226_s17  ;;  %s1294_s16 = scalar_lea.vmem %s239_s12, 64 }
  0x2d   : > { %p1283_p7 = pneg %p1601_p5  ;;  %p1295_p2 = scmp.ne.s32.totalorder %s239_s12, %s1294_s16 }
  0x2e   : > { %s1454_s13 = smov [#allocation2]  }
  0x2f   : > { %p1297_p6 = pnand %p1295_p2, %p1283_p7  ;;  %s1299_s7 = sshll.u32 %s1454_s13, 4  ;;  %s1300_s7 = int_to_ptr.vmem [resolvable:$false] %s1299_s7 }
  0x30   : > { %s1301_s6 = scalar_lea.vmem %s1300_s7, 128  ;;  %p1302_p13 = scmp.lt.s32.totalorder %s239_s12, %s1300_s7 }
  0x31   : > { %p1298_p9 = pneg %p1297_p6  ;;  %p1303_p11 = scmp.lt.s32.totalorder %s1301_s6, %s1294_s16 }
  0x33   : > { %p1304_p10 = por %p1303_p11, %p1302_p13 }
  0x35   : > { %p1305_p1 = pnand %p1304_p10, %p1298_p9 }
  0x37   : > { %1308 = shalt.err (!%p1305_p1)
}
  0x38   : > { %1176 = dma.hbm_to_vmem [thread:$0]  (!%p1601_p5), %s236_s10, 64, %s239_s12, %s227_s1  }
  0x39   : > { %247 = sbr.rel (%p1551_p8) target bundleno = 570 (0x23a), region = 32  ;;  %s1612_s14 = sand.u32 (!%p1551_p8), 1, %s1433_s19  }
  0x3a   : > { %s1123_s17 = sshll.u32 (!%p1551_p8), %s1612_s14, 2  ;;  %s250_s29 = scalar_lea.sflag (!%p1551_p8), [#allocation3], %s1612_s14 }
  0x3b   : > { %s253_s8 = scalar_lea.vmem (!%p1551_p8), [#allocation2], %s1123_s17 }
  0x3e   : > { %1412 = dma.done.wait (%p1541_p4), %s250_s29, 64  }
  0x3f   : > { %1414 = vsyncadd (%p1541_p4), %s250_s29, 4294967232  ;;  %p1862_p1 = scmp.eq.s32.totalorder %s1530_s24, 0 }
  0x41   : > { %1416 = dma.done.wait (%p1862_p1), [#allocation6], 256   ;;  %p1863_p10 = pmov %p1862_p1 }
  0x42   : > { %v1455_v0 = vmov 0.0   ;;  %vm1456_vm0 = vmmov 0   ;;  %v1253_v1 = vld [vmem:[#allocation5 + $0x8] sm:$0xff]   ;;  %v1254_v2 = vld [vmem:[#allocation5] sm:$0xff]   ;;  %v295_v3 = vld [vmem:[%s253_s8] sm:$0xf]  ;;  %v374_v13 = vlaneseq }
  0x43   : > { %1418 = vsyncadd (%p1863_p10), [#allocation6], 4294967040  ;;  %1149 = vmatprep.subr.bf16.mxu0 %v1455_v0  ;;  %1153 = vmatprep.mubr.msk.bf16.mxu0 %vm1456_vm0, %v1455_v0  ;;  %vm319_vm1 = vcmask 261120   ;;  %v1128_v4 = vld [vmem:[%s1844_s2] ss:$0 sm:$0xff]  ;;  %s1457_s26 = smov 104  }
  0x44   : > { %1150 = vmatpush3.bf16.msra.mxu0 %v1253_v1  ;;  %s1458_s28 = smov 120   ;;  %s1459_s7 = smov 96   ;;  %v1462_v11 = vmov 1983009808   ;;  %v1463_v14 = vmov 1934713408  }
  0x45   : > { %1151 = vmatprep.subr.bf16.mxu0 %v1455_v0  ;;  %s1460_s9 = smov 112   ;;  %s1461_s10 = smov 64   ;;  %v372_v12 = vunpack.c.l.s4 %v1462_v11  ;;  %v389_v15 = vunpack.c.l.s4 %v1463_v14  ;;  %v375_v17 = vshrl.u32 %v374_v13, 7  ;;  %v1464_v34 = vmov 0  }
  0x46   : > { %s1653_s11 = sshll.u32 %s1612_s14, 4  ;;  %vm536_vm2 = vcmask 60416   ;;  %s1661_s16 = sshll.u32 %s1441_s21, 8 }
  0x47   : > { %v373_v16 = vunpack.c.0.s8 %v372_v12  ;;  %v390_v18 = vunpack.c.0.s8 %v389_v15  ;;  %s279_s12 = scalar_lea.vmem [#allocation7], %s1653_s11  ;;  %s1670_s17 = scalar_lea.hbm %s1845_s3, %s1661_s16 }
  0x48   : > { %1152 = vmatpush3.bf16.msra.mxu0 %v1254_v2  ;;  %s922_s29 = sshll.u32 %s279_s12, 4  ;;  %s898_s21 = scalar_lea.sflag [#allocation4], %s1612_s14  ;;  %s1672_s29 = int_to_ptr.vmem [resolvable:$true] %s922_s29 }
  0x49   : > { %v1628_v19 = vsub.s32 %v373_v16, %v375_v17  ;;  %v1631_v23 = vsub.s32 %v390_v18, %v375_v17  ;;  %s1309_s8 = scalar_lea.vmem %s1672_s29, 256  ;;  %s1465_s1 = smov [#allocation7]  }
  0x4a   : > { %p1310_p4 = scmp.ne.s32.totalorder %s1672_s29, %s1309_s8  ;;  %s1313_s25 = sshll.u32 %s1465_s1, 4  ;;  %s1314_s25 = int_to_ptr.vmem [resolvable:$false] %s1313_s25 }
  0x4b   : > { %1154 = vmatmul.mubr.msk.bf16.vlgmr.msra.gmra.mxu0 %vm319_vm1, %v295_v3  ;;  %p1316_p3 = scmp.lt.s32.totalorder %s1672_s29, %s1314_s25 }
  0x4c   : > { %p1311_p8 = pnand %p1310_p4, %p1584_p0 }
  0x4e   : > { %p1312_p12 = pneg %p1311_p8 }
 0x10b   : > { %v357_v5 = vpop.f32.mrf.mxu0 }
 0x10c   : > { %v358_v6 = vadd.f32 %v1128_v4, %v357_v5 }
 0x10d   : > { %v1155_v7 = vpop.f32.mrf.mxu0 }
 0x10e   : > { %v363_v8 = vpack.c.bf16 %v358_v6, %v358_v6 }
 0x10f   : > { %v360_v9 = vpop.f32.mrf.mxu0 }
 0x110   : > { %369 = vrot.lane.b32.xlu1 %v363_v8, %s1457_s26  ;;  %365 = vrot.lane.b32.xlu0 %v363_v8, %s1458_s28  ;;  %v377_v30 = vrot.slane %v363_v8, %v1628_v19  ;;  %s1315_s26 = scalar_lea.vmem %s1314_s25, 512 }
 0x111   : > { %v1156_v10 = vpop.f32.mrf.mxu0  ;;  %p1317_p5 = scmp.lt.s32.totalorder %s1315_s26, %s1309_s8 }
 0x113   : > { %p1318_p7 = por %p1317_p5, %p1316_p3 }
 0x114   : > { %541 = vrot.lane.b32.xlu1 %v363_v8, %s1459_s7  ;;  %367 = vrot.lane.b32.xlu0 %v363_v8, %s1460_s9 }
 0x115   : > { %p1319_p2 = pnand %p1318_p7, %p1312_p12 }
 0x118   : > { %719 = vrot.lane.b32.xlu1 %v363_v8, %s1461_s10 }
 0x182   : > { %v370_v20 = vpop.permute.xlu1 %369  ;;  %v366_v21 = vpop.permute.xlu0 %365 }
 0x183   : > { %v419_v22 = vrot.slane %v370_v20, %v1628_v19  ;;  %v411_v24 = vrot.slane %v366_v21, %v1628_v19  ;;  %543 = vrot.lane.b32.xlu0 %v366_v21, %s1459_s7 }
 0x185   : > { %v420_v25 = vcombine.low %v411_v24, %v419_v22  ;;  %v421_v26 = vcombine.high %v411_v24, %v419_v22 }
 0x186   : > { %v368_v27 = vpop.permute.xlu0 %367 }
 0x187   : > { %v428_v28 = vrot.slane %v420_v25, %v1631_v23  ;;  %v385_v29 = vrot.slane %v368_v27, %v1628_v19  ;;  %547 = vrot.lane.b32.xlu0 %v370_v20, %s1459_s7  ;;  %545 = vrot.lane.b32.xlu1 %v368_v27, %s1459_s7  ;;  %v435_v31 = vrot.slane %v421_v26, %v1631_v23 }
 0x189   : > { %v386_v32 = vcombine.low %v377_v30, %v385_v29  ;;  %v387_v33 = vcombine.high %v377_v30, %v385_v29  ;;  %v436_v35 = vcombine.high %v428_v28, %v1464_v34  ;;  %v437_v38 = vcombine.high %v435_v31, %v1464_v34 }
 0x18a   : > { %v443_v39 = vshrl.u32 %v428_v28, 16  ;;  %v459_v45 = vshrl.u32 %v435_v31, 16 }
 0x18b   : > { %721 = vrot.lane.b32.xlu0 %v366_v21, %s1461_s10  ;;  %v394_v36 = vrot.slane %v386_v32, %v1631_v23  ;;  %v401_v37 = vrot.slane %v387_v33, %v1631_v23  ;;  %723 = vrot.lane.b32.xlu1 %v368_v27, %s1461_s10  ;;  %v451_v44 = vshrl.u32 %v436_v35, 16  ;;  %v467_v52 = vshrl.u32 %v437_v38, 16 }
 0x18d   : > { %v402_v40 = vcombine.high %v394_v36, %v1464_v34  ;;  %v403_v41 = vcombine.high %v401_v37, %v1464_v34  ;;  %v440_v42 = vpack.i.b16 %v428_v28, %v394_v36  ;;  %v442_v43 = vshrl.u32 %v394_v36, 16 }
 0x18e   : > { %v456_v46 = vpack.i.b16 %v435_v31, %v401_v37  ;;  %v458_v47 = vshrl.u32 %v401_v37, 16 }
 0x18f   : > { %725 = vrot.lane.b32.xlu0 %v370_v20, %s1461_s10  ;;  %v444_v48 = vpack.i.b16 %v443_v39, %v442_v43  ;;  %v448_v49 = vpack.i.b16 %v436_v35, %v402_v40  ;;  %v450_v50 = vshrl.u32 %v402_v40, 16  ;;  %v464_v51 = vpack.i.b16 %v437_v38, %v403_v41 }
 0x190   : > { %v460_v53 = vpack.i.b16 %v459_v45, %v458_v47  ;;  %v466_v54 = vshrl.u32 %v403_v41, 16  ;;  %v470_v55 = vcombine.low %v440_v42, %v456_v46 }
 0x191   : > { %v452_v56 = vpack.i.b16 %v451_v44, %v450_v50  ;;  %v478_v57 = vcombine.low %v448_v49, %v464_v51 }
 0x192   : > { %v468_v58 = vpack.i.b16 %v467_v52, %v466_v54  ;;  %v495_v59 = vcombine.low %v444_v48, %v460_v53  ;;  %v477_v60 = vrot.slane %v470_v55, %v1628_v19 }
 0x193   : > { %v485_v61 = vrot.slane %v478_v57, %v1628_v19 }
 0x194   : > { %v503_v62 = vcombine.low %v452_v56, %v468_v58  ;;  %v502_v0 = vrot.slane %v495_v59, %v1628_v19 }
 0x195   : > { %v486_v63 = vcombine.low %v477_v60, %v485_v61 }
 0x196   : > { %v510_v1 = vrot.slane %v503_v62, %v1628_v19 }
 0x197   : > { %v493_v2 = vrot.slane %v486_v63, %v1631_v23 }
 0x198   : > { %v511_v3 = vcombine.low %v502_v0, %v510_v1 }
 0x199   : > { %v494_v4 = vcombine.high %v493_v2, %v1464_v34  ;;  %v524_v8 = vshrl.u32 %v493_v2, 16 }
 0x19a   : > { %v518_v5 = vrot.slane %v511_v3, %v1631_v23 }
 0x19b   : > { %v532_v12 = vshrl.u32 %v494_v4, 16 }
 0x19c   : > { %v519_v6 = vcombine.high %v518_v5, %v1464_v34  ;;  %v522_v7 = vpack.i.b16 %v518_v5, %v493_v2  ;;  %v525_v9 = vshrl.u32 %v518_v5, 16 }
 0x19e   : > { %v526_v10 = vpack.i.b16 %v525_v9, %v524_v8  ;;  %v530_v11 = vpack.i.b16 %v519_v6, %v494_v4  ;;  %v533_v13 = vshrl.u32 %v519_v6, 16  ;;  %537 = vst.msk [vmem:[%s279_s12] sm:$0xf] %vm536_vm2, %v522_v7 }
 0x1a0   : > { %v534_v14 = vpack.i.b16 %v533_v13, %v532_v12  ;;  %538 = vst.msk [vmem:[%s279_s12 + $0x4] sm:$0xf] %vm536_vm2, %v526_v10  ;;  %539 = vst.msk [vmem:[%s279_s12 + $0x8] sm:$0xf] %vm536_vm2, %v530_v11 }
 0x1a2   : > { %540 = vst.msk [vmem:[%s279_s12 + $0xc] sm:$0xf] %vm536_vm2, %v534_v14 }
 0x1a3   : > { %1322 = shalt.err (!%p1319_p2)
}
 0x1a4   : > { %s1323_s28 = scalar_lea.hbm %s1670_s17, 256  ;;  %s1327_s12 = scalar_lea.hbm %s1845_s3, 512 }
 0x1a5   : > { %p1324_p6 = scmp.ne.s32.totalorder %s1670_s17, %s1323_s28  ;;  %p1328_p11 = scmp.lt.s32.totalorder %s1670_s17, %s1845_s3 }
 0x1a6   : > { %p1329_p1 = scmp.lt.s32.totalorder %s1327_s12, %s1323_s28 }
 0x1a7   : > { %p1325_p9 = pnand %p1324_p6, %p1584_p0 }
 0x1a8   : > { %p1330_p10 = por %p1329_p1, %p1328_p11 }
 0x1a9   : > { %p1326_p13 = pneg %p1325_p9 }
 0x1ab   : > { %p1331_p4 = pnand %p1330_p10, %p1326_p13 }
 0x1ad   : > { %1334 = shalt.err (!%p1331_p4)
}
 0x1ae   : > { %s1466_s8 = smov 4   ;;  %v542_v15 = vpop.permute.xlu1 %541  ;;  %s902_s14 = sand.u32 1, %s1530_s24  }
 0x1af   : > { %1163 = dma.vmem_to_hbm [thread:$0]  (%p1584_p0), %s1672_s29, 256, %s1670_s17, %s898_s21, %s1461_s10, %s1461_s10, %s1466_s8   ;;  %v556_v24 = vrot.slane %v542_v15, %v1628_v19 }
 0x1b0   : > { %s286_s17 = scalar_lea.vmem [#allocation8], %s1653_s11  ;;  %s1743_s1 = scalar_lea.hbm %s1846_s4, %s1661_s16 }
 0x1b1   : > { %s939_s29 = sshll.u32 %s286_s17, 4  ;;  %s1750_s25 = scalar_lea.sflag [#allocation9], %s902_s14  ;;  %s1745_s29 = int_to_ptr.vmem [resolvable:$true] %s939_s29 }
 0x1b2   : > { %v720_v17 = vpop.permute.xlu1 %719  ;;  %s1335_s26 = scalar_lea.vmem %s1745_s29, 256  ;;  %s1467_s28 = smov [#allocation8]  }
 0x1b3   : > { %v734_v31 = vrot.slane %v720_v17, %v1628_v19  ;;  %p1336_p8 = scmp.ne.s32.totalorder %s1745_s29, %s1335_s26  ;;  %s1339_s7 = sshll.u32 %s1467_s28, 4  ;;  %s1340_s7 = int_to_ptr.vmem [resolvable:$false] %s1339_s7 }
 0x1b4   : > { %s1341_s9 = scalar_lea.vmem %s1340_s7, 512  ;;  %p1342_p5 = scmp.lt.s32.totalorder %s1745_s29, %s1340_s7 }
 0x1b5   : > { %p1337_p12 = pnand %p1336_p8, %p1584_p0  ;;  %p1343_p7 = scmp.lt.s32.totalorder %s1341_s9, %s1335_s26 }
 0x1b7   : > { %p1338_p3 = pneg %p1337_p12  ;;  %p1344_p2 = por %p1343_p7, %p1342_p5 }
 0x1b9   : > { %p1345_p6 = pnand %p1344_p2, %p1338_p3 }
 0x1f5   : > { %v544_v16 = vpop.permute.xlu0 %543 }
 0x1f6   : > { %v590_v20 = vrot.slane %v544_v16, %v1628_v19 }
 0x1f9   : > { %v548_v18 = vpop.permute.xlu0 %547  ;;  %v546_v21 = vpop.permute.xlu1 %545 }
 0x1fa   : > { %v598_v22 = vrot.slane %v548_v18, %v1628_v19  ;;  %v564_v25 = vrot.slane %v546_v21, %v1628_v19 }
 0x1fc   : > { %v599_v26 = vcombine.low %v590_v20, %v598_v22  ;;  %v600_v27 = vcombine.high %v590_v20, %v598_v22  ;;  %v565_v28 = vcombine.low %v556_v24, %v564_v25  ;;  %v566_v29 = vcombine.high %v556_v24, %v564_v25 }
 0x1fd   : > { %v722_v30 = vpop.permute.xlu0 %721  ;;  %v724_v35 = vpop.permute.xlu1 %723 }
 0x1fe   : > { %v607_v32 = vrot.slane %v599_v26, %v1631_v23  ;;  %v614_v33 = vrot.slane %v600_v27, %v1631_v23  ;;  %v573_v36 = vrot.slane %v565_v28, %v1631_v23  ;;  %v580_v37 = vrot.slane %v566_v29, %v1631_v23 }
 0x1ff   : > { %v742_v38 = vrot.slane %v724_v35, %v1628_v19  ;;  %v768_v39 = vrot.slane %v722_v30, %v1628_v19 }
 0x200   : > { %v615_v40 = vcombine.high %v607_v32, %v1464_v34  ;;  %v616_v41 = vcombine.high %v614_v33, %v1464_v34  ;;  %v622_v42 = vshrl.u32 %v607_v32, 16  ;;  %v638_v43 = vshrl.u32 %v614_v33, 16 }
 0x201   : > { %v581_v44 = vcombine.high %v573_v36, %v1464_v34  ;;  %v582_v45 = vcombine.high %v580_v37, %v1464_v34  ;;  %v621_v46 = vshrl.u32 %v573_v36, 16  ;;  %v637_v47 = vshrl.u32 %v580_v37, 16  ;;  %v726_v52 = vpop.permute.xlu0 %725 }
 0x202   : > { %v619_v48 = vpack.i.b16 %v607_v32, %v573_v36  ;;  %v630_v49 = vshrl.u32 %v615_v40, 16  ;;  %v635_v50 = vpack.i.b16 %v614_v33, %v580_v37  ;;  %v646_v51 = vshrl.u32 %v616_v41, 16 }
 0x203   : > { %v629_v53 = vshrl.u32 %v581_v44, 16  ;;  %v645_v54 = vshrl.u32 %v582_v45, 16  ;;  %v623_v55 = vpack.i.b16 %v622_v42, %v621_v46  ;;  %v627_v56 = vpack.i.b16 %v615_v40, %v581_v44 }
 0x204   : > { %v639_v57 = vpack.i.b16 %v638_v43, %v637_v47  ;;  %v643_v58 = vpack.i.b16 %v616_v41, %v582_v45  ;;  %v649_v59 = vcombine.low %v619_v48, %v635_v50  ;;  %v743_v60 = vcombine.low %v734_v31, %v742_v38 }
 0x205   : > { %v631_v61 = vpack.i.b16 %v630_v49, %v629_v53  ;;  %v647_v62 = vpack.i.b16 %v646_v51, %v645_v54  ;;  %v744_v63 = vcombine.high %v734_v31, %v742_v38  ;;  %v776_v0 = vrot.slane %v726_v52, %v1628_v19 }
 0x206   : > { %v657_v1 = vcombine.low %v627_v56, %v643_v58  ;;  %v674_v2 = vcombine.low %v623_v55, %v639_v57  ;;  %v751_v3 = vrot.slane %v743_v60, %v1631_v23  ;;  %v656_v8 = vrot.slane %v649_v59, %v1628_v19 }
 0x207   : > { %v682_v4 = vcombine.low %v631_v61, %v647_v62  ;;  %v758_v5 = vrot.slane %v744_v63, %v1631_v23  ;;  %v777_v6 = vcombine.low %v768_v39, %v776_v0  ;;  %v778_v7 = vcombine.high %v768_v39, %v776_v0 }
 0x208   : > { %v664_v9 = vrot.slane %v657_v1, %v1628_v19  ;;  %v681_v10 = vrot.slane %v674_v2, %v1628_v19  ;;  %v759_v11 = vcombine.high %v751_v3, %v1464_v34  ;;  %v799_v14 = vshrl.u32 %v751_v3, 16 }
 0x209   : > { %v689_v12 = vrot.slane %v682_v4, %v1628_v19  ;;  %v760_v13 = vcombine.high %v758_v5, %v1464_v34  ;;  %v785_v15 = vrot.slane %v777_v6, %v1631_v23  ;;  %v815_v18 = vshrl.u32 %v758_v5, 16 }
 0x20a   : > { %v665_v16 = vcombine.low %v656_v8, %v664_v9  ;;  %v807_v17 = vshrl.u32 %v759_v11, 16  ;;  %v792_v20 = vrot.slane %v778_v7, %v1631_v23 }
 0x20b   : > { %v690_v21 = vcombine.low %v681_v10, %v689_v12  ;;  %v823_v22 = vshrl.u32 %v760_v13, 16  ;;  %v793_v24 = vcombine.high %v785_v15, %v1464_v34  ;;  %v797_v25 = vpack.i.b16 %v785_v15, %v751_v3 }
 0x20c   : > { %v672_v26 = vrot.slane %v665_v16, %v1631_v23  ;;  %v794_v27 = vcombine.high %v792_v20, %v1464_v34  ;;  %v800_v28 = vshrl.u32 %v785_v15, 16  ;;  %v813_v29 = vpack.i.b16 %v792_v20, %v758_v5 }
 0x20d   : > { %v697_v30 = vrot.slane %v690_v21, %v1631_v23  ;;  %v805_v31 = vpack.i.b16 %v793_v24, %v759_v11  ;;  %v808_v32 = vshrl.u32 %v793_v24, 16  ;;  %v816_v33 = vshrl.u32 %v792_v20, 16 }
 0x20e   : > { %v673_v35 = vcombine.high %v672_v26, %v1464_v34  ;;  %v703_v36 = vshrl.u32 %v672_v26, 16  ;;  %v801_v37 = vpack.i.b16 %v800_v28, %v799_v14  ;;  %v821_v38 = vpack.i.b16 %v794_v27, %v760_v13 }
 0x20f   : > { %v698_v39 = vcombine.high %v697_v30, %v1464_v34  ;;  %v701_v40 = vpack.i.b16 %v697_v30, %v672_v26  ;;  %v704_v41 = vshrl.u32 %v697_v30, 16  ;;  %v809_v42 = vpack.i.b16 %v808_v32, %v807_v17 }
 0x210   : > { %v711_v43 = vshrl.u32 %v673_v35, 16  ;;  %v817_v44 = vpack.i.b16 %v816_v33, %v815_v18  ;;  %v824_v45 = vshrl.u32 %v794_v27, 16  ;;  %v827_v46 = vcombine.low %v797_v25, %v813_v29 }
 0x211   : > { %v705_v47 = vpack.i.b16 %v704_v41, %v703_v36  ;;  %v709_v48 = vpack.i.b16 %v698_v39, %v673_v35  ;;  %v712_v49 = vshrl.u32 %v698_v39, 16  ;;  %v835_v50 = vcombine.low %v805_v31, %v821_v38  ;;  %715 = vst.msk [vmem:[%s286_s17] sm:$0xf] %vm536_vm2, %v701_v40 }
 0x212   : > { %v825_v51 = vpack.i.b16 %v824_v45, %v823_v22  ;;  %v852_v52 = vcombine.low %v801_v37, %v817_v44  ;;  %v834_v54 = vrot.slane %v827_v46, %v1628_v19 }
 0x213   : > { %v713_v53 = vpack.i.b16 %v712_v49, %v711_v43  ;;  %v842_v55 = vrot.slane %v835_v50, %v1628_v19  ;;  %716 = vst.msk [vmem:[%s286_s17 + $0x4] sm:$0xf] %vm536_vm2, %v705_v47  ;;  %717 = vst.msk [vmem:[%s286_s17 + $0x8] sm:$0xf] %vm536_vm2, %v709_v48 }
 0x214   : > { %v860_v56 = vcombine.low %v809_v42, %v825_v51  ;;  %v859_v58 = vrot.slane %v852_v52, %v1628_v19 }
 0x215   : > { %v843_v57 = vcombine.low %v834_v54, %v842_v55  ;;  %718 = vst.msk [vmem:[%s286_s17 + $0xc] sm:$0xf] %vm536_vm2, %v713_v53 }
 0x216   : > { %v867_v59 = vrot.slane %v860_v56, %v1628_v19 }
 0x217   : > { %1348 = shalt.err (!%p1345_p6)
}
 0x218   : > { %s1349_s12 = scalar_lea.hbm %s1743_s1, 256  ;;  %s1353_s14 = scalar_lea.hbm %s1846_s4, 512 }
 0x219   : > { %p1350_p9 = scmp.ne.s32.totalorder %s1743_s1, %s1349_s12  ;;  %p1354_p1 = scmp.lt.s32.totalorder %s1743_s1, %s1846_s4 }
 0x21a   : > { %p1355_p10 = scmp.lt.s32.totalorder %s1353_s14, %s1349_s12 }
 0x21b   : > { %p1351_p13 = pnand %p1350_p9, %p1584_p0 }
 0x21c   : > { %p1356_p4 = por %p1355_p10, %p1354_p1 }
 0x21d   : > { %p1352_p11 = pneg %p1351_p13 }
 0x21f   : > { %p1357_p8 = pnand %p1356_p4, %p1352_p11 }
 0x221   : > { %1360 = shalt.err (!%p1357_p8)
}
 0x222   : > { %1164 = dma.vmem_to_hbm [thread:$0]  (%p1584_p0), %s1745_s29, 256, %s1743_s1, %s1750_s25, %s1461_s10, %s1461_s10, %s1466_s8   ;;  %v850_v19 = vrot.slane %v843_v57, %v1631_v23  ;;  %v868_v60 = vcombine.low %v859_v58, %v867_v59 }
 0x223   : > { %s293_s21 = scalar_lea.vmem [#allocation10], %s1653_s11  ;;  %s1788_s28 = scalar_lea.hbm %s1847_s5, %s1661_s16 }
 0x224   : > { %v851_v61 = vcombine.high %v850_v19, %v1464_v34  ;;  %v875_v62 = vrot.slane %v868_v60, %v1631_v23  ;;  %v881_v1 = vshrl.u32 %v850_v19, 16  ;;  %s956_s26 = sshll.u32 %s293_s21, 4  ;;  %s1468_s7 = smov [#allocation10]   ;;  %s1790_s26 = int_to_ptr.vmem [resolvable:$true] %s956_s26 }
 0x225   : > { %s1361_s11 = scalar_lea.vmem %s1790_s26, 256  ;;  %s1365_s9 = sshll.u32 %s1468_s7, 4  ;;  %s1366_s9 = int_to_ptr.vmem [resolvable:$false] %s1365_s9 }
 0x226   : > { %v876_v63 = vcombine.high %v875_v62, %v1464_v34  ;;  %v879_v0 = vpack.i.b16 %v875_v62, %v850_v19  ;;  %v882_v2 = vshrl.u32 %v875_v62, 16  ;;  %v889_v5 = vshrl.u32 %v851_v61, 16  ;;  %p1362_p12 = scmp.ne.s32.totalorder %s1790_s26, %s1361_s11  ;;  %s1367_s12 = scalar_lea.vmem %s1366_s9, 512 }
 0x227   : > { %p1368_p7 = scmp.lt.s32.totalorder %s1790_s26, %s1366_s9  ;;  %p1369_p2 = scmp.lt.s32.totalorder %s1367_s12, %s1361_s11 }
 0x228   : > { %v883_v3 = vpack.i.b16 %v882_v2, %v881_v1  ;;  %v887_v4 = vpack.i.b16 %v876_v63, %v851_v61  ;;  %v890_v6 = vshrl.u32 %v876_v63, 16  ;;  %893 = vst.msk [vmem:[%s293_s21] sm:$0xf] %vm536_vm2, %v879_v0  ;;  %p1363_p3 = pnand %p1362_p12, %p1584_p0 }
 0x229   : > { %p1370_p6 = por %p1369_p2, %p1368_p7 }
 0x22a   : > { %v891_v7 = vpack.i.b16 %v890_v6, %v889_v5  ;;  %894 = vst.msk [vmem:[%s293_s21 + $0x4] sm:$0xf] %vm536_vm2, %v883_v3  ;;  %895 = vst.msk [vmem:[%s293_s21 + $0x8] sm:$0xf] %vm536_vm2, %v887_v4  ;;  %p1364_p5 = pneg %p1363_p3 }
 0x22c   : > { %896 = vst.msk [vmem:[%s293_s21 + $0xc] sm:$0xf] %vm536_vm2, %v891_v7  ;;  %p1371_p9 = pnand %p1370_p6, %p1364_p5 }
 0x22e   : > { %1374 = shalt.err (!%p1371_p9)
}
 0x22f   : > { %s1375_s16 = scalar_lea.hbm %s1788_s28, 256  ;;  %s1379_s14 = scalar_lea.hbm %s1847_s5, 512 }
 0x230   : > { %p1376_p13 = scmp.ne.s32.totalorder %s1788_s28, %s1375_s16  ;;  %p1380_p10 = scmp.lt.s32.totalorder %s1788_s28, %s1847_s5 }
 0x231   : > { %p1381_p4 = scmp.lt.s32.totalorder %s1379_s14, %s1375_s16 }
 0x232   : > { %p1377_p11 = pnand %p1376_p13, %p1584_p0 }
 0x233   : > { %p1382_p8 = por %p1381_p4, %p1380_p10 }
 0x234   : > { %p1378_p1 = pneg %p1377_p11 }
 0x236   : > { %p1383_p12 = pnand %p1382_p8, %p1378_p1 }
 0x238   : > { %1386 = shalt.err (!%p1383_p12)
}
 0x239   : > { %1165 = dma.vmem_to_hbm [thread:$0]  (%p1584_p0), %s1790_s26, 256, %s1788_s28, %s1750_s25, %s1461_s10, %s1461_s10, %s1466_s8  }
 0x23a PF: > { %s971_s21 = sand.u32 1, %s1429_s18   ;;  %p1864_p3 = scmp.ne.s32.totalorder %s1853_s27, 0 }
 0x23b   : > { %p1865_p5 = scmp.ge.s32.totalorder %s1449_s23, 2  ;;  %s972_s29 = scalar_lea.sflag [#allocation4], %s971_s21 }
 0x23d   : > { %p1178_p7 = pnand %p1865_p5, %p1864_p3 }
 0x23f   : > { %p1179_p2 = pneg %p1178_p7 }
 0x241   : > { %1420 = dma.done.wait (%p1179_p2), %s972_s29, 256  }
 0x242   : > { %1422 = vsyncadd (%p1179_p2), %s972_s29, 4294967040  ;;  %s1866_s15 = sadd.s32 4294967294, %s1449_s23  }
 0x243   : > { %s980_s1 = sand.u32 1, %s1866_s15  }
 0x244   : > { %s981_s11 = scalar_lea.sflag [#allocation9], %s980_s1 }
 0x245   : > { %1424 = dma.done.wait (%p1179_p2), %s981_s11, 512  }
 0x246   : > { %1426 = vsyncadd (%p1179_p2), %s981_s11, 4294966784  ;;  %s26_s23 = sadd.s32 1, %s1449_s23   ;;  %s1867_s27 = sld [smem:[#allocation15_spill]] }
 0x247   : > { %p23_p0 = scmp.ge.s32.totalorder %s26_s23, 4   ;;  %s1868_s18 = smov %s1433_s19 }
 0x248   : > { %s1869_s19 = smov %s1437_s20  ;;  %s1870_s20 = smov %s1593_s30 }
 0x249   : > { %s1871_s21 = smov %s1445_s22  ;;  %25 = sbr.rel (!%p23_p0) target bundleno = 11 (0xb), region = 113 }
 0x24c   : > { %s1872_s22 = smov %s1867_s27 }
 0x24e   :  { %995 = vsyncpa [#allocation3], 1 }
 0x24f   :  { %997 = vsyncpa [#allocation3 + $0x1], 1 }
 0x250   :  { %998 = vsyncpa [#allocation6], 1 }
 0x251   :  { %999 = vsyncpa [#allocation4], 1 }
 0x252   :  { %1001 = vsyncpa [#allocation4 + $0x1], 1 }
 0x253   :  { %1002 = vsyncpa [#allocation9], 1 }
 0x254   :  { %1004 = vsyncpa [#allocation9 + $0x1], 1 }

</bundles_post_ra>
